<compile_context>
chip_gen: v5e
topology: v5e:2x2
jax: 0.10.0
libtpu: 0.0.40
codegen_flags: <defaults>
</compile_context>

<pallas_src>
import functools

import jax
import jax.numpy as jnp
from jax import lax
from jax.experimental import pallas as pl
from jax.experimental.pallas import tpu as pltpu


LANES = 128
SUBLANES = 8
TARGET_TILE_BYTES = 2 * 1024 * 1024   # ~2 MiB per operand block per step
MAX_UNROLL = 8


def _num_parallel_slices():
    # Only v7x has 2 TensorCores per chip worth splitting the stream over;
    # on single-TC chips (v5e/v6e) the extra grid axis is pure loop overhead.
    try:
        kind = jax.devices()[0].device_kind.lower()
    except Exception:
        return 1
    return 2 if "v7" in kind else 1


def _dice_partial_kernel(p_ref, t_ref, acc_ref, *, tile_rows, chunk_rows,
                         steps, rows_valid, needs_mask):
    """Accumulate per-(sublane, lane) partial sums of p*t, p*p, t*t.

    acc_ref is the (3, chunk_rows, 128) f32 output block for this slice; its
    block index only depends on the outer (parallel) grid axis, so it stays
    resident across the inner (arbitrary) reduction axis.
    """
    s = pl.program_id(0)   # slice (parallel; one per TensorCore on v7x)
    k = pl.program_id(1)   # reduction step within the slice

    @pl.when(k == 0)
    def _init():
        acc_ref[...] = jnp.zeros_like(acc_ref)

    n_chunks = tile_rows // chunk_rows
    unroll = min(MAX_UNROLL, n_chunks)
    block = s * steps + k              # intended (unclamped) block index
    block_start = block * tile_rows    # global row offset of this block

    def accumulate(masked):
        def body(c, carry):
            acc_pt, acc_pp, acc_tt = carry
            r = pl.multiple_of(c * chunk_rows, chunk_rows)
            p = p_ref[pl.ds(r, chunk_rows), :].astype(jnp.float32)
            t = t_ref[pl.ds(r, chunk_rows), :].astype(jnp.float32)
            if masked:
                row0 = block_start + r
                row_ids = row0 + lax.broadcasted_iota(
                    jnp.int32, (chunk_rows, LANES), 0)
                valid = row_ids < rows_valid
                # Mask the operands (not the products) so garbage rows from
                # the over-read DMA region cannot propagate NaN/Inf.
                p = jnp.where(valid, p, 0.0)
                t = jnp.where(valid, t, 0.0)
            return acc_pt + p * t, acc_pp + p * p, acc_tt + t * t

        zero = jnp.zeros((chunk_rows, LANES), jnp.float32)
        acc_pt, acc_pp, acc_tt = lax.fori_loop(
            0, n_chunks, body, (zero, zero, zero), unroll=unroll)
        acc_ref[0] += acc_pt
        acc_ref[1] += acc_pp
        acc_ref[2] += acc_tt

    if not needs_mask:
        # Fast path: every block is fully in range; pure vld+vmul+vadd.
        accumulate(masked=False)
    else:
        is_full = block_start + tile_rows <= rows_valid
        is_partial = jnp.logical_and(jnp.logical_not(is_full),
                                     block_start < rows_valid)

        @pl.when(is_full)
        def _full():
            accumulate(masked=False)

        @pl.when(is_partial)
        def _partial():
            accumulate(masked=True)
        # Fully over-issued blocks (block_start >= rows_valid) skip entirely.


def dice_loss(preds, targets, smooth=1.0, _max_tile_rows=None):
    assert preds.shape == targets.shape, "preds/targets must match in shape"

    # Flatten in native dtype (no host-side f32 upcast; copy-free for
    # contiguous inputs).
    p_flat = preds.reshape(-1)
    t_flat = targets.reshape(-1)
    n = p_flat.shape[0]

    if n == 0:
        s = jnp.float32(smooth)
        return jnp.float32(1.0) - s / s

    # Dtype-aware sublane packing: sub-32-bit dtypes pack along sublanes, so
    # the minimum aligned chunk is (8 * pack, 128) rows.
    item_p = jnp.dtype(p_flat.dtype).itemsize
    item_t = jnp.dtype(t_flat.dtype).itemsize
    min_item = min(item_p, item_t)
    max_item = max(item_p, item_t)
    pack = max(1, 4 // max(1, min_item))
    chunk_rows = SUBLANES * pack          # one packed vreg per load
    base = chunk_rows * LANES             # pad-alignment in elements

    rem = n % base
    if rem:
        # TODO(synk): unaligned element counts pay one pad copy here.
        pad = base - rem
        p_flat = jnp.pad(p_flat, (0, pad))
        t_flat = jnp.pad(t_flat, (0, pad))

    rows = p_flat.shape[0] // LANES       # multiple of chunk_rows
    p2d = p_flat.reshape(rows, LANES)
    t2d = t_flat.reshape(rows, LANES)

    # Byte-budgeted tile (~2 MiB for the widest operand), multiple of chunk.
    budget_rows = TARGET_TILE_BYTES // (LANES * max_item)
    max_tile_rows = max(chunk_rows, (budget_rows // chunk_rows) * chunk_rows)
    if _max_tile_rows is not None:        # test hook to force small tiles
        max_tile_rows = max(chunk_rows,
                            (_max_tile_rows // chunk_rows) * chunk_rows)
    tile_rows = min(max_tile_rows, rows)

    total_blocks = -(-rows // tile_rows)
    n_slices = _num_parallel_slices()
    n_slices = n_slices if total_blocks >= n_slices else 1
    steps = -(-total_blocks // n_slices)
    issued_blocks = n_slices * steps
    needs_mask = (rows % tile_rows != 0) or (issued_blocks != total_blocks)

    def in_index_map(si, ki):
        # Contiguous halves per slice: each TensorCore streams one contiguous
        # HBM range.  Clamp so an over-issued DMA never targets an
        # out-of-range block (its contribution is skipped in-kernel).
        b = si * steps + ki
        if needs_mask:
            b = jnp.minimum(b, total_blocks - 1)
        return (b, 0)

    kernel = functools.partial(
        _dice_partial_kernel,
        tile_rows=tile_rows,
        chunk_rows=chunk_rows,
        steps=steps,
        rows_valid=rows,
        needs_mask=needs_mask,
    )

    # 2 inputs x 2 pipeline buffers x block bytes, plus headroom; stays well
    # under v5e's 16 MiB scoped-VMEM default at the 2 MiB/operand budget.
    tile_bytes = tile_rows * LANES * (item_p + item_t)
    vmem_limit = int(max(16 * 1024 * 1024, 2 * tile_bytes + 4 * 1024 * 1024))

    partials = pl.pallas_call(
        kernel,
        out_shape=jax.ShapeDtypeStruct(
            (n_slices, 3, chunk_rows, LANES), jnp.float32),
        grid_spec=pltpu.PrefetchScalarGridSpec(
            num_scalar_prefetch=0,
            grid=(n_slices, steps),
            in_specs=[
                pl.BlockSpec((tile_rows, LANES), in_index_map),
                pl.BlockSpec((tile_rows, LANES), in_index_map),
            ],
            out_specs=pl.BlockSpec((None, 3, chunk_rows, LANES),
                                   lambda si, ki: (si, 0, 0, 0)),
        ),
        compiler_params=pltpu.CompilerParams(
            dimension_semantics=("parallel", "arbitrary"),
            vmem_limit_bytes=vmem_limit,
        ),
    )(p2d, t2d)

    # Tiny final reduce (n_slices*3*chunk_rows*128 floats) + smooth/divide.
    sums = jnp.sum(partials, axis=(0, 2, 3))   # [sum(pt), sum(pp), sum(tt)]
    numerator = 2.0 * sums[0] + smooth
    denominator = sums[1] + sums[2] + smooth
    return 1.0 - numerator / denominator


if __name__ == "__main__":
    def ref_dice(p, t, smooth=1.0):
        p = p.astype(jnp.float32)
        t = t.astype(jnp.float32)
        num = 2.0 * jnp.sum(p * t) + smooth
        den = jnp.sum(p * p) + jnp.sum(t * t) + smooth
        return 1.0 - num / den

    key = jax.random.PRNGKey(0)
    kp, kt = jax.random.split(key)

    # Case 1: small NCHW-like segmentation shapes (aligned, copy-free path).
    shape = (2, 4, 16, 16)
    preds = jax.nn.sigmoid(jax.random.normal(kp, shape, dtype=jnp.float32))
    targets = (jax.random.uniform(kt, shape) > 0.5).astype(jnp.float32)
    loss = jax.block_until_ready(dice_loss(preds, targets, smooth=1.0))
    ref = ref_dice(preds, targets, smooth=1.0)
    assert jnp.allclose(loss, ref, atol=1e-5, rtol=1e-5), (loss, ref)

    # Case 2: multi-block grid with a partial last block (exercises the
    # pl.when-gated mask path) via a forced small tile.
    kp2, kt2 = jax.random.split(jax.random.PRNGKey(1))
    shape2 = (2, 4, 24, 48)   # 9216 elems -> 72 rows; tile 64 -> full + partial
    preds2 = jax.nn.sigmoid(jax.random.normal(kp2, shape2, dtype=jnp.float32))
    targets2 = (jax.random.uniform(kt2, shape2) > 0.5).astype(jnp.float32)
    loss2 = jax.block_until_ready(
        dice_loss(preds2, targets2, smooth=1.0, _max_tile_rows=64))
    ref2 = ref_dice(preds2, targets2, smooth=1.0)
    assert jnp.allclose(loss2, ref2, atol=1e-5, rtol=1e-5), (loss2, ref2)

    # Case 3: bf16 inputs (packed-sublane alignment + in-kernel upcast path).
    preds3 = preds.astype(jnp.bfloat16)
    targets3 = targets.astype(jnp.bfloat16)
    loss3 = jax.block_until_ready(dice_loss(preds3, targets3, smooth=1.0))
    ref3 = ref_dice(preds3, targets3, smooth=1.0)
    assert jnp.allclose(loss3, ref3, atol=1e-3, rtol=1e-3), (loss3, ref3)

    print("KERNEL_OK")
</pallas_src>

<mosaic_0001>
module attributes {stable_mosaic.version = 11 : i64} {
  func.func @_dice_partial_kernel(%arg0: i32, %arg1: i32, %arg2: memref<16x128xf32, #tpu.memory_space<vmem>>, %arg3: memref<16x128xf32, #tpu.memory_space<vmem>>, %arg4: memref<1x3x8x128xf32, #tpu.memory_space<vmem>>) attributes {dimension_semantics = [#tpu.dimension_semantics<parallel>, #tpu.dimension_semantics<arbitrary>], iteration_bounds = array<i64: 1, 1>, scalar_prefetch = 0 : i64, scratch_operands = 0 : i64, tpu.core_type = #tpu.core_type<tc>, window_params = [{transform_indices = @transform_0, window_bounds = array<i64: 16, 128>}, {transform_indices = @transform_1, window_bounds = array<i64: 16, 128>}, {transform_indices = @transform_2, window_bounds = array<i64: 1, 3, 8, 128>}]} {
    %c0_i32 = arith.constant 0 : i32
    %0 = arith.cmpi eq, %arg1, %c0_i32 : i32
    %1 = arith.extui %0 : i1 to i32
    %c0_i32_0 = arith.constant 0 : i32
    %2 = arith.cmpi ne, %1, %c0_i32_0 : i32
    scf.if %2 {
      %cst_28 = arith.constant 0.000000e+00 : f32
      %46 = vector.broadcast %cst_28 : f32 to vector<3x8x128xf32>
      %c0_29 = arith.constant 0 : index
      %c0_30 = arith.constant 0 : index
      %c0_31 = arith.constant 0 : index
      %c0_32 = arith.constant 0 : index
      %47 = vector.load %arg4[%c0_29, %c0_30, %c0_31, %c0_32] : memref<1x3x8x128xf32, #tpu.memory_space<vmem>>, vector<1x3x8x128xf32>
      %48 = vector.shape_cast %47 : vector<1x3x8x128xf32> to vector<3x8x128xf32>
      %49 = vector.shape_cast %46 : vector<3x8x128xf32> to vector<1x3x8x128xf32>
      tpu.vector_store %arg4[%c0_29, %c0_30, %c0_31, %c0_32], %49 {strides = array<i32>} : memref<1x3x8x128xf32, #tpu.memory_space<vmem>>, vector<1x3x8x128xf32>,
    } else {
    }
    %cst = arith.constant 0.000000e+00 : f32
    %3 = vector.broadcast %cst : f32 to vector<8x128xf32>
    %c0_i32_1 = arith.constant 0 : i32
    %c8_i32 = arith.constant 8 : i32
    %4 = arith.muli %c0_i32_1, %c8_i32 : i32
    %5 = tpu.assume_multiple %4, 8 : i32
    %6 = arith.index_cast %5 : i32 to index
    %c0 = arith.constant 0 : index
    %7 = vector.load %arg2[%6, %c0] : memref<16x128xf32, #tpu.memory_space<vmem>>, vector<8x128xf32>
    %8 = arith.index_cast %5 : i32 to index
    %c0_2 = arith.constant 0 : index
    %9 = vector.load %arg3[%8, %c0_2] : memref<16x128xf32, #tpu.memory_space<vmem>>, vector<8x128xf32>
    %10 = arith.mulf %7, %9 : vector<8x128xf32>
    %11 = arith.addf %3, %10 : vector<8x128xf32>
    %12 = arith.mulf %7, %7 : vector<8x128xf32>
    %13 = arith.addf %3, %12 : vector<8x128xf32>
    %14 = arith.mulf %9, %9 : vector<8x128xf32>
    %15 = arith.addf %3, %14 : vector<8x128xf32>
    %c1_i32 = arith.constant 1 : i32
    %c8_i32_3 = arith.constant 8 : i32
    %16 = arith.muli %c1_i32, %c8_i32_3 : i32
    %17 = tpu.assume_multiple %16, 8 : i32
    %18 = arith.index_cast %17 : i32 to index
    %c0_4 = arith.constant 0 : index
    %19 = vector.load %arg2[%18, %c0_4] : memref<16x128xf32, #tpu.memory_space<vmem>>, vector<8x128xf32>
    %20 = arith.index_cast %17 : i32 to index
    %c0_5 = arith.constant 0 : index
    %21 = vector.load %arg3[%20, %c0_5] : memref<16x128xf32, #tpu.memory_space<vmem>>, vector<8x128xf32>
    %22 = arith.mulf %19, %21 : vector<8x128xf32>
    %23 = arith.addf %11, %22 : vector<8x128xf32>
    %24 = arith.mulf %19, %19 : vector<8x128xf32>
    %25 = arith.addf %13, %24 : vector<8x128xf32>
    %26 = arith.mulf %21, %21 : vector<8x128xf32>
    %27 = arith.addf %15, %26 : vector<8x128xf32>
    %c2_i32 = arith.constant 2 : i32
    %c0_6 = arith.constant 0 : index
    %c0_7 = arith.constant 0 : index
    %c0_8 = arith.constant 0 : index
    %c0_9 = arith.constant 0 : index
    %28 = vector.load %arg4[%c0_6, %c0_7, %c0_8, %c0_9] : memref<1x3x8x128xf32, #tpu.memory_space<vmem>>, vector<1x1x8x128xf32>
    %29 = vector.shape_cast %28 : vector<1x1x8x128xf32> to vector<8x128xf32>
    %30 = arith.addf %29, %23 : vector<8x128xf32>
    %c0_10 = arith.constant 0 : index
    %c0_11 = arith.constant 0 : index
    %c0_12 = arith.constant 0 : index
    %c0_13 = arith.constant 0 : index
    %31 = vector.load %arg4[%c0_10, %c0_11, %c0_12, %c0_13] : memref<1x3x8x128xf32, #tpu.memory_space<vmem>>, vector<1x1x8x128xf32>
    %32 = vector.shape_cast %31 : vector<1x1x8x128xf32> to vector<8x128xf32>
    %33 = vector.shape_cast %30 : vector<8x128xf32> to vector<1x1x8x128xf32>
    tpu.vector_store %arg4[%c0_10, %c0_11, %c0_12, %c0_13], %33 {strides = array<i32>} : memref<1x3x8x128xf32, #tpu.memory_space<vmem>>, vector<1x1x8x128xf32>,
    %c0_14 = arith.constant 0 : index
    %c1 = arith.constant 1 : index
    %c0_15 = arith.constant 0 : index
    %c0_16 = arith.constant 0 : index
    %34 = vector.load %arg4[%c0_14, %c1, %c0_15, %c0_16] : memref<1x3x8x128xf32, #tpu.memory_space<vmem>>, vector<1x1x8x128xf32>
    %35 = vector.shape_cast %34 : vector<1x1x8x128xf32> to vector<8x128xf32>
    %36 = arith.addf %35, %25 : vector<8x128xf32>
    %c0_17 = arith.constant 0 : index
    %c1_18 = arith.constant 1 : index
    %c0_19 = arith.constant 0 : index
    %c0_20 = arith.constant 0 : index
    %37 = vector.load %arg4[%c0_17, %c1_18, %c0_19, %c0_20] : memref<1x3x8x128xf32, #tpu.memory_space<vmem>>, vector<1x1x8x128xf32>
    %38 = vector.shape_cast %37 : vector<1x1x8x128xf32> to vector<8x128xf32>
    %39 = vector.shape_cast %36 : vector<8x128xf32> to vector<1x1x8x128xf32>
    tpu.vector_store %arg4[%c0_17, %c1_18, %c0_19, %c0_20], %39 {strides = array<i32>} : memref<1x3x8x128xf32, #tpu.memory_space<vmem>>, vector<1x1x8x128xf32>,
    %c0_21 = arith.constant 0 : index
    %c2 = arith.constant 2 : index
    %c0_22 = arith.constant 0 : index
    %c0_23 = arith.constant 0 : index
    %40 = vector.load %arg4[%c0_21, %c2, %c0_22, %c0_23] : memref<1x3x8x128xf32, #tpu.memory_space<vmem>>, vector<1x1x8x128xf32>
    %41 = vector.shape_cast %40 : vector<1x1x8x128xf32> to vector<8x128xf32>
    %42 = arith.addf %41, %27 : vector<8x128xf32>
    %c0_24 = arith.constant 0 : index
    %c2_25 = arith.constant 2 : index
    %c0_26 = arith.constant 0 : index
    %c0_27 = arith.constant 0 : index
    %43 = vector.load %arg4[%c0_24, %c2_25, %c0_26, %c0_27] : memref<1x3x8x128xf32, #tpu.memory_space<vmem>>, vector<1x1x8x128xf32>
    %44 = vector.shape_cast %43 : vector<1x1x8x128xf32> to vector<8x128xf32>
    %45 = vector.shape_cast %42 : vector<8x128xf32> to vector<1x1x8x128xf32>
    tpu.vector_store %arg4[%c0_24, %c2_25, %c0_26, %c0_27], %45 {strides = array<i32>} : memref<1x3x8x128xf32, #tpu.memory_space<vmem>>, vector<1x1x8x128xf32>,
    return
  }
  func.func @transform_0(%arg0: i32, %arg1: i32) -> (i32, i32) {
    %c1_i32 = arith.constant 1 : i32
    %0 = arith.muli %arg0, %c1_i32 : i32
    %1 = arith.addi %0, %arg1 : i32
    %c0_i32 = arith.constant 0 : i32
    %c0_i32_0 = arith.constant 0 : i32
    return %1, %c0_i32 : i32, i32
  }
  func.func @transform_1(%arg0: i32, %arg1: i32) -> (i32, i32) {
    %c1_i32 = arith.constant 1 : i32
    %0 = arith.muli %arg0, %c1_i32 : i32
    %1 = arith.addi %0, %arg1 : i32
    %c0_i32 = arith.constant 0 : i32
    %c0_i32_0 = arith.constant 0 : i32
    return %1, %c0_i32 : i32, i32
  }
  func.func @transform_2(%arg0: i32, %arg1: i32) -> (i32, i32, i32, i32) {
    %c0_i32 = arith.constant 0 : i32
    %c0_i32_0 = arith.constant 0 : i32
    %c0_i32_1 = arith.constant 0 : i32
    %c0_i32_2 = arith.constant 0 : i32
    return %arg0, %c0_i32, %c0_i32_0, %c0_i32_1 : i32, i32, i32, i32
  }
}

</mosaic_0001>

<bundles_post_ra>
// kernel: tpu_custom_call.1
= control target key start
LH: loop header
LB: loop body
LE: loop exit
PB: predicated region body
PF: predicated region fallthrough
CT: control target
= control target key end

     0   :  { %7 = vsyncpa [#allocation3], 0  ;;  %s234_s0 = inlined_call_operand.hbm [shape: f32[16,128], index: 0, kind: input, shape index: {}]   ;;  %s235_s1 = inlined_call_operand.hbm [shape: f32[16,128], index: 1, kind: input, shape index: {}]   ;;  %s236_s2 = inlined_call_operand.hbm [shape: f32[1,3,8,128], index: 2, kind: output, shape index: {}]  }
   0x1   :  { %8 = vsyncpa [#allocation6], 0 }
   0x2   :  { %9 = vsyncpa [#allocation4], 0  ;;  %s18_s11 = sshll.u32 %s234_s0, 4  ;;  %s196_s12 = smov [#allocation2]   ;;  %s19_s11 = int_to_ptr.hbm [resolvable:$true] %s18_s11 }
   0x3   :  { %s20_s13 = sshll.u32 %s196_s12, 4  ;;  %s35_s16 = sshll.u32 %s235_s1, 4  ;;  %s21_s13 = int_to_ptr.vmem [resolvable:$true] %s20_s13  ;;  %s36_s16 = int_to_ptr.hbm [resolvable:$true] %s35_s16 }
   0x4   :  { %s197_s17 = smov 128   ;;  %s198_s18 = smov 8  }
   0x5   :  { %26 = dma.hbm_to_vmem [thread:$0]  %s19_s11, 256, %s21_s13, [#allocation3], %s197_s17, %s197_s17, %s198_s18  }
   0x6   :  { %s199_s19 = smov [#allocation5]  }
   0x7   :  { %s37_s20 = sshll.u32 %s199_s19, 4  ;;  %s38_s20 = int_to_ptr.vmem [resolvable:$true] %s37_s20 }
   0x8   :  { %43 = dma.hbm_to_vmem [thread:$0]  %s36_s16, 256, %s38_s20, [#allocation6], %s197_s17, %s197_s17, %s198_s18  }
   0x9   :  { %190 = dma.done.wait [#allocation3], 256  }
   0xa   :  { %191 = vsyncadd [#allocation3], 4294967040 }
   0xb   :  { %192 = dma.done.wait [#allocation6], 256  }
   0xc   :  { %193 = vsyncadd [#allocation6], 4294967040  ;;  %v63_v0 = vld [vmem:[#allocation2] sm:$0xff]  ;;  %v64_v1 = vld [vmem:[#allocation5] sm:$0xff]  ;;  %s200_s0 = smov [#allocation7]   ;;  %s98_s23 = sshll.u32 %s236_s2, 4  ;;  %s99_s23 = int_to_ptr.hbm [resolvable:$true] %s98_s23 }
   0xd   :  { %v72_v2 = vld [vmem:[#allocation2 + $0x8] sm:$0xff]  ;;  %v65_v3 = vmul.f32 %v64_v1, %v63_v0  ;;  %v74_v4 = vld [vmem:[#allocation5 + $0x8] sm:$0xff]  ;;  %v67_v5 = vmul.f32 %v63_v0, %v63_v0  ;;  %v69_v7 = vmul.f32 %v64_v1, %v64_v1  ;;  %s96_s1 = sshll.u32 %s200_s0, 4  ;;  %s97_s1 = int_to_ptr.vmem [resolvable:$true] %s96_s1 }
   0xe   :  { %v77_v6 = vmul.f32 %v72_v2, %v72_v2  ;;  %v75_v8 = vmul.f32 %v74_v4, %v72_v2  ;;  %v79_v9 = vmul.f32 %v74_v4, %v74_v4 }
  0x10   :  { %v78_v10 = vadd.f32 %v77_v6, %v67_v5  ;;  %v76_v11 = vadd.f32 %v75_v8, %v65_v3  ;;  %v80_v12 = vadd.f32 %v79_v9, %v69_v7 }
  0x12   :  { %87 = vst [vmem:[#allocation7 + $0x8] sm:$0xff] %v78_v10 }
  0x13   :  { %83 = vst [vmem:[#allocation7] sm:$0xff] %v76_v11 }
  0x14   :  { %91 = vst [vmem:[#allocation7 + $0x10] sm:$0xff] %v80_v12 }
  0x15   :  { %104 = dma.vmem_to_hbm [thread:$0]  %s97_s1, 384, %s99_s23, [#allocation4], %s197_s17, %s197_s17, %s198_s18  }
  0x16   :  { %194 = dma.done.wait [#allocation4], 384  }
  0x17   :  { %195 = vsyncadd [#allocation4], 4294966912 }
  0x18   :  { %109 = vsyncpa [#allocation3], 1 }
  0x19   :  { %110 = vsyncpa [#allocation6], 1 }
  0x1a   :  { %111 = vsyncpa [#allocation4], 1 }

</bundles_post_ra>
